<compile_context>
chip_gen: v6e
topology: v6e:2x2x1
jax: 0.10.0
libtpu: 0.0.40
codegen_flags: <defaults>
</compile_context>

<pallas_src>
import math

import jax
import jax.numpy as jnp
from jax.experimental import pallas as pl
from jax.experimental.pallas import tpu as pltpu

_DECAY = 0.95
_INPUT = 0.05


def _make_kernel(C, n_chunks, I, S_pad):
    """Kernel closure over static config. Per-grid-step block views:
       x (C, D) f32 chunk of one batch element; weights resident full arrays."""
    ln_decay = math.log(_DECAY)

    def kernel(x_ref, w_in_x_ref, w_in_g_ref, w_conv_ref, b_conv_ref,
               wB_ref, wC_ref, d_ref, w_out_ref, gamma_ref, beta_ref,
               out_ref, xin_buf, h_ref):
        chunk = pl.program_id(1)

        x = x_ref[...]                                     # (C, D) f32
        x_bf = x.astype(jnp.bfloat16)

        # ---- in_proj (bias-free), bf16 MXU matmuls with f32 accumulation ----
        x_in = jnp.dot(x_bf, w_in_x_ref[...], preferred_element_type=jnp.float32)   # (C, I)
        x_gate = jnp.dot(x_bf, w_in_g_ref[...], preferred_element_type=jnp.float32)  # (C, I)

        # ---- reset per-sequence carries at the first T-chunk of each batch ----
        @pl.when(chunk == 0)
        def _():
            xin_buf[0:8, :] = jnp.zeros((8, I), jnp.float32)
            h_ref[...] = jnp.zeros((1, S_pad), jnp.float32)

        # ---- causal depthwise conv1d (k=4, left zero-pad 3, truncate to T) ----
        # x_conv[t] = b + sum_{s=0..3} w[3-s] * x_in[t-s]
        # Implemented as VPU multiply-adds on sublane-shifted views of a small
        # carry buffer (rows [0,8) = previous chunk's last 8 x_in rows, rows
        # [8,8+C) = this chunk) — no shift-matrix matmuls.
        xin_buf[8:8 + C, :] = x_in
        wc = w_conv_ref[...]                               # (4, I) f32
        acc = x_in * wc[3:4, :] + b_conv_ref[...]          # tap s=0 (no shift)
        for s in range(1, 4):                              # taps s=1..3 (static)
            acc = acc + wc[3 - s:4 - s, :] * xin_buf[8 - s:8 - s + C, :]
        if n_chunks > 1:                                   # carry tail for next chunk
            xin_buf[0:8, :] = x_in[C - 8:C, :]
        u = acc * jax.nn.sigmoid(acc)                      # SiLU, f32

        # ---- SSM: chunked decay scan ----
        #   h_t = 0.95*h_{t-1} + 0.05*(u_t @ W_B)
        #   within a chunk:  H = L @ (u @ W_B) + 0.95^(t+1) * h_carry
        #   L[t,s] = 0.05 * 0.95^(t-s) for s<=t (built in-kernel, (C,C) only)
        tr = jax.lax.broadcasted_iota(jnp.int32, (C, C), 0)
        tc = jax.lax.broadcasted_iota(jnp.int32, (C, C), 1)
        delta = tr - tc
        deltaf = jnp.maximum(delta, 0).astype(jnp.float32)
        L = jnp.where(delta >= 0, _INPUT * jnp.exp(deltaf * ln_decay), 0.0)
        d_pow = (_DECAY / _INPUT) * L[:, 0:1]              # 0.95^(t+1), shape (C, 1)

        U = jnp.dot(u, wB_ref[...], preferred_element_type=jnp.float32)       # (C, S_pad) f32
        H = jnp.dot(L, U, preferred_element_type=jnp.float32) + d_pow * h_ref[...]
        h_ref[...] = H[C - 1:C, :]                         # carry h to next chunk
        y = jnp.dot(H.astype(jnp.bfloat16), wC_ref[...],
                    preferred_element_type=jnp.float32) + d_ref[...] * u       # (C, I)

        # ---- gating, out_proj, residual + LayerNorm ----
        y = y * (x_gate * jax.nn.sigmoid(x_gate))
        y_out = jnp.dot(y.astype(jnp.bfloat16), w_out_ref[...],
                        preferred_element_type=jnp.float32)                    # (C, D)
        z = y_out + x
        mu = jnp.mean(z, axis=-1, keepdims=True)
        var = jnp.mean(jnp.square(z - mu), axis=-1, keepdims=True)
        zn = (z - mu) * jax.lax.rsqrt(var + 1e-5)
        out_ref[...] = (zn * gamma_ref[...] + beta_ref[...]).astype(out_ref.dtype)

    return kernel


def _vmem_limit_bytes():
    cap = 64 * 1024 * 1024                  # conservative fallback (v7x physical)
    try:
        cap = int(pltpu.get_tpu_info().vmem_capacity_bytes)
    except Exception:
        pass
    # ~48 MiB on v7x (64 MiB physical), ~100 MiB on v5e/v6e (128 MiB physical).
    return int(min(cap - 16 * 1024 * 1024, 100 * 1024 * 1024))


def _pick_chunk(T, target=256):
    """Largest multiple-of-8 divisor of T that is <= target (else whole T)."""
    if T <= target or T % 8 != 0:
        return T
    best = 8
    for c in range(8, target + 1, 8):
        if T % c == 0:
            best = c
    return best


def infinite_mamba_core(x, params, chunk=None):
    """x: (B, T, D) float32. Returns LayerNorm(out_proj(ssm(x)) + x), float32."""
    B, T, D = x.shape
    I = params["w_in"].shape[1] // 2
    S = params["wB"].shape[1]
    S_pad = ((S + 127) // 128) * 128        # lane-dense state dim (64 -> 128)

    if chunk is None:
        chunk = _pick_chunk(T)
    n_chunks = T // chunk
    assert chunk * n_chunks == T, "T must be divisible by the chunk size"

    # One-time weight prep in XLA: bf16 for the big I-dim matmul operands,
    # f32 for the small SSM matmuls; zero-pad the state dim to 128 lanes.
    w_in_x = params["w_in"][:, :I].astype(jnp.bfloat16)
    w_in_g = params["w_in"][:, I:].astype(jnp.bfloat16)
    wB = jnp.zeros((I, S_pad), jnp.float32).at[:, :S].set(params["wB"])
    wC = jnp.zeros((S_pad, I), jnp.float32).at[:S, :].set(params["wC"]).astype(jnp.bfloat16)
    w_out = params["w_out"].astype(jnp.bfloat16)

    def resident(a):  # whole array, constant block index -> stays in VMEM
        nd = a.ndim
        return pl.BlockSpec(a.shape, lambda b, t, _nd=nd: (0,) * _nd)

    x_spec = pl.BlockSpec((pl.Squeezed(), chunk, D), lambda b, t: (b, t, 0))

    args = (x, w_in_x, w_in_g, params["w_conv"], params["b_conv"], wB, wC,
            params["Dvec"], w_out, params["gamma"], params["beta"])
    in_specs = [x_spec] + [resident(a) for a in args[1:]]

    # TODO(synk): single-buffer the resident weights (pipeline_mode=pl.Buffered(1))
    # to halve their VMEM footprint on v7x once that path is exercised here.
    # TODO(synk): the module's cross-call `continuous_state` buffer is not carried;
    # each call starts from h = 0 (the module's reset path).
    # NOTE: on v7x give the "parallel" batch axis >= 2 grid points per chip so both
    # TensorCores are used (demo uses B=2).  If model dim D < 128 the output stores
    # are lane-masked; pad D / fold an axis for production shapes if D stays small.
    return pl.pallas_call(
        _make_kernel(chunk, n_chunks, I, S_pad),
        out_shape=jax.ShapeDtypeStruct((B, T, D), jnp.float32),
        grid=(B, n_chunks),
        in_specs=in_specs,
        out_specs=x_spec,
        scratch_shapes=[
            pltpu.VMEM((chunk + 8, I), jnp.float32),   # conv input + 8-row tail carry
            pltpu.VMEM((1, S_pad), jnp.float32),       # SSM h-state carry
        ],
        compiler_params=pltpu.CompilerParams(
            dimension_semantics=("parallel", "arbitrary"),
            vmem_limit_bytes=_vmem_limit_bytes(),
        ),
    )(*args)


def init_params(key, dim, state_size=64, expand_factor=2):
    inner = dim * expand_factor
    ks = jax.random.split(key, 6)
    return dict(
        w_in=jax.random.normal(ks[0], (dim, 2 * inner), jnp.float32) * 0.05,
        w_conv=jax.random.normal(ks[1], (4, inner), jnp.float32) * 0.1,
        b_conv=jax.random.normal(ks[2], (1, inner), jnp.float32) * 0.1,
        wB=jax.random.normal(ks[3], (inner, state_size), jnp.float32) * 0.05,
        wC=jax.random.normal(ks[4], (state_size, inner), jnp.float32) * 0.05,
        Dvec=jnp.zeros((1, inner), jnp.float32),      # nn.init.zeros_(self.D)
        w_out=jax.random.normal(ks[5], (inner, dim), jnp.float32) * 0.05,
        gamma=jnp.ones((1, dim), jnp.float32),        # LayerNorm weight
        beta=jnp.zeros((1, dim), jnp.float32),        # LayerNorm bias
    )


if __name__ == "__main__":
    B, T, dim = 2, 8, 32
    state_size, expand = 64, 2
    key = jax.random.PRNGKey(0)
    kx, kp = jax.random.split(key)
    x = jax.random.normal(kx, (B, T, dim), jnp.float32)
    params = init_params(kp, dim, state_size=state_size, expand_factor=expand)

    out = infinite_mamba_core(x, params)
    jax.block_until_ready(out)
    assert out.shape == (B, T, dim)
    assert bool(jnp.all(jnp.isfinite(out)))
    print("KERNEL_OK")
</pallas_src>

<mosaic_0001>
module attributes {stable_mosaic.version = 11 : i64} {
  func.func @kernel(%arg0: i32, %arg1: i32, %arg2: memref<1x8x32xf32, #tpu.memory_space<vmem>>, %arg3: memref<32x64xbf16, #tpu.memory_space<vmem>>, %arg4: memref<32x64xbf16, #tpu.memory_space<vmem>>, %arg5: memref<4x64xf32, #tpu.memory_space<vmem>>, %arg6: memref<1x64xf32, #tpu.memory_space<vmem>>, %arg7: memref<64x128xf32, #tpu.memory_space<vmem>>, %arg8: memref<128x64xbf16, #tpu.memory_space<vmem>>, %arg9: memref<1x64xf32, #tpu.memory_space<vmem>>, %arg10: memref<64x32xbf16, #tpu.memory_space<vmem>>, %arg11: memref<1x32xf32, #tpu.memory_space<vmem>>, %arg12: memref<1x32xf32, #tpu.memory_space<vmem>>, %arg13: memref<1x8x32xf32, #tpu.memory_space<vmem>>, %arg14: memref<16x64xf32, #tpu.memory_space<vmem>>, %arg15: memref<1x128xf32, #tpu.memory_space<vmem>>) attributes {dimension_semantics = [#tpu.dimension_semantics<parallel>, #tpu.dimension_semantics<arbitrary>], iteration_bounds = array<i64: 2, 1>, scalar_prefetch = 0 : i64, scratch_operands = 2 : i64, tpu.core_type = #tpu.core_type<tc>, window_params = [{transform_indices = @transform_0, window_bounds = array<i64: 1, 8, 32>}, {pipeline_mode = #tpu.pipeline_mode<synchronous>, transform_indices = @transform_1, window_bounds = array<i64: 32, 64>}, {pipeline_mode = #tpu.pipeline_mode<synchronous>, transform_indices = @transform_2, window_bounds = array<i64: 32, 64>}, {pipeline_mode = #tpu.pipeline_mode<synchronous>, transform_indices = @transform_3, window_bounds = array<i64: 4, 64>}, {pipeline_mode = #tpu.pipeline_mode<synchronous>, transform_indices = @transform_4, window_bounds = array<i64: 1, 64>}, {pipeline_mode = #tpu.pipeline_mode<synchronous>, transform_indices = @transform_5, window_bounds = array<i64: 64, 128>}, {pipeline_mode = #tpu.pipeline_mode<synchronous>, transform_indices = @transform_6, window_bounds = array<i64: 128, 64>}, {pipeline_mode = #tpu.pipeline_mode<synchronous>, transform_indices = @transform_7, window_bounds = array<i64: 1, 64>}, {pipeline_mode = #tpu.pipeline_mode<synchronous>, transform_indices = @transform_8, window_bounds = array<i64: 64, 32>}, {pipeline_mode = #tpu.pipeline_mode<synchronous>, transform_indices = @transform_9, window_bounds = array<i64: 1, 32>}, {pipeline_mode = #tpu.pipeline_mode<synchronous>, transform_indices = @transform_10, window_bounds = array<i64: 1, 32>}, {transform_indices = @transform_11, window_bounds = array<i64: 1, 8, 32>}]} {
    %c0 = arith.constant 0 : index
    %c0_0 = arith.constant 0 : index
    %c0_1 = arith.constant 0 : index
    %0 = vector.load %arg2[%c0, %c0_0, %c0_1] : memref<1x8x32xf32, #tpu.memory_space<vmem>>, vector<1x8x32xf32>
    %1 = vector.shape_cast %0 : vector<1x8x32xf32> to vector<8x32xf32>
    %2 = arith.truncf %1 : vector<8x32xf32> to vector<8x32xbf16>
    %c0_2 = arith.constant 0 : index
    %c0_3 = arith.constant 0 : index
    %3 = vector.load %arg3[%c0_2, %c0_3] : memref<32x64xbf16, #tpu.memory_space<vmem>>, vector<32x64xbf16>
    %cst = arith.constant dense<0.000000e+00> : vector<8x64xf32>
    %4 = tpu.matmul %2, %3, %cst {dimension_numbers = #tpu.dot_dimension_numbers<[1], [0], [0], [1], [0, 0, 1, 1], [], []>} : vector<8x32xbf16>, vector<32x64xbf16>, vector<8x64xf32> -> vector<8x64xf32>
    %c0_4 = arith.constant 0 : index
    %c0_5 = arith.constant 0 : index
    %5 = vector.load %arg4[%c0_4, %c0_5] : memref<32x64xbf16, #tpu.memory_space<vmem>>, vector<32x64xbf16>
    %cst_6 = arith.constant dense<0.000000e+00> : vector<8x64xf32>
    %6 = tpu.matmul %2, %5, %cst_6 {dimension_numbers = #tpu.dot_dimension_numbers<[1], [0], [0], [1], [0, 0, 1, 1], [], []>} : vector<8x32xbf16>, vector<32x64xbf16>, vector<8x64xf32> -> vector<8x64xf32>
    %c0_i32 = arith.constant 0 : i32
    %7 = arith.cmpi eq, %arg1, %c0_i32 : i32
    %8 = arith.extui %7 : i1 to i32
    %c0_i32_7 = arith.constant 0 : i32
    %9 = arith.cmpi ne, %8, %c0_i32_7 : i32
    scf.if %9 {
      %cst_52 = arith.constant 0.000000e+00 : f32
      %112 = vector.broadcast %cst_52 : f32 to vector<8x64xf32>
      %c0_53 = arith.constant 0 : index
      %c0_54 = arith.constant 0 : index
      %113 = vector.load %arg14[%c0_53, %c0_54] : memref<16x64xf32, #tpu.memory_space<vmem>>, vector<8x64xf32>
      tpu.vector_store %arg14[%c0_53, %c0_54], %112 {strides = array<i32>} : memref<16x64xf32, #tpu.memory_space<vmem>>, vector<8x64xf32>,
      %cst_55 = arith.constant 0.000000e+00 : f32
      %114 = vector.broadcast %cst_55 : f32 to vector<1x128xf32>
      %c0_56 = arith.constant 0 : index
      %c0_57 = arith.constant 0 : index
      %115 = vector.load %arg15[%c0_56, %c0_57] : memref<1x128xf32, #tpu.memory_space<vmem>>, vector<1x128xf32>
      tpu.vector_store %arg15[%c0_56, %c0_57], %114 {strides = array<i32>} : memref<1x128xf32, #tpu.memory_space<vmem>>, vector<1x128xf32>,
    } else {
    }
    %c8 = arith.constant 8 : index
    %c0_8 = arith.constant 0 : index
    %10 = vector.load %arg14[%c8, %c0_8] : memref<16x64xf32, #tpu.memory_space<vmem>>, vector<8x64xf32>
    tpu.vector_store %arg14[%c8, %c0_8], %4 {strides = array<i32>} : memref<16x64xf32, #tpu.memory_space<vmem>>, vector<8x64xf32>,
    %c0_9 = arith.constant 0 : index
    %c0_10 = arith.constant 0 : index
    %11 = vector.load %arg5[%c0_9, %c0_10] : memref<4x64xf32, #tpu.memory_space<vmem>>, vector<4x64xf32>
    %12 = vector.extract_strided_slice %11 {offsets = [3, 0], sizes = [1, 64], strides = [1, 1]} : vector<4x64xf32> to vector<1x64xf32>
    %13 = vector.broadcast %12 : vector<1x64xf32> to vector<8x64xf32>
    %14 = arith.mulf %4, %13 : vector<8x64xf32>
    %c0_11 = arith.constant 0 : index
    %c0_12 = arith.constant 0 : index
    %15 = vector.load %arg6[%c0_11, %c0_12] : memref<1x64xf32, #tpu.memory_space<vmem>>, vector<1x64xf32>
    %16 = vector.broadcast %15 : vector<1x64xf32> to vector<8x64xf32>
    %17 = arith.addf %14, %16 : vector<8x64xf32>
    %18 = vector.extract_strided_slice %11 {offsets = [2, 0], sizes = [1, 64], strides = [1, 1]} : vector<4x64xf32> to vector<1x64xf32>
    %c7 = arith.constant 7 : index
    %c0_13 = arith.constant 0 : index
    %19 = vector.load %arg14[%c7, %c0_13] : memref<16x64xf32, #tpu.memory_space<vmem>>, vector<8x64xf32>
    %20 = vector.broadcast %18 : vector<1x64xf32> to vector<8x64xf32>
    %21 = arith.mulf %20, %19 : vector<8x64xf32>
    %22 = arith.addf %17, %21 : vector<8x64xf32>
    %23 = vector.extract_strided_slice %11 {offsets = [1, 0], sizes = [1, 64], strides = [1, 1]} : vector<4x64xf32> to vector<1x64xf32>
    %c6 = arith.constant 6 : index
    %c0_14 = arith.constant 0 : index
    %24 = vector.load %arg14[%c6, %c0_14] : memref<16x64xf32, #tpu.memory_space<vmem>>, vector<8x64xf32>
    %25 = vector.broadcast %23 : vector<1x64xf32> to vector<8x64xf32>
    %26 = arith.mulf %25, %24 : vector<8x64xf32>
    %27 = arith.addf %22, %26 : vector<8x64xf32>
    %28 = vector.extract_strided_slice %11 {offsets = [0, 0], sizes = [1, 64], strides = [1, 1]} : vector<4x64xf32> to vector<1x64xf32>
    %c5 = arith.constant 5 : index
    %c0_15 = arith.constant 0 : index
    %29 = vector.load %arg14[%c5, %c0_15] : memref<16x64xf32, #tpu.memory_space<vmem>>, vector<8x64xf32>
    %30 = vector.broadcast %28 : vector<1x64xf32> to vector<8x64xf32>
    %31 = arith.mulf %30, %29 : vector<8x64xf32>
    %32 = arith.addf %27, %31 : vector<8x64xf32>
    %33 = arith.negf %32 : vector<8x64xf32>
    %34 = math.exp %33 : vector<8x64xf32>
    %cst_16 = arith.constant 1.000000e+00 : f32
    %35 = vector.broadcast %cst_16 : f32 to vector<8x64xf32>
    %36 = arith.addf %35, %34 : vector<8x64xf32>
    %37 = arith.divf %35, %36 : vector<8x64xf32>
    %38 = arith.mulf %32, %37 : vector<8x64xf32>
    %39 = tpu.iota {dimensions = array<i32: 0>} : vector<8x8xi32>
    %40 = tpu.iota {dimensions = array<i32: 1>} : vector<8x8xi32>
    %41 = arith.subi %39, %40 : vector<8x8xi32>
    %c0_i32_17 = arith.constant 0 : i32
    %42 = vector.broadcast %c0_i32_17 : i32 to vector<8x8xi32>
    %43 = arith.maxsi %41, %42 : vector<8x8xi32>
    %44 = arith.sitofp %43 : vector<8x8xi32> to vector<8x8xf32>
    %c0_i32_18 = arith.constant 0 : i32
    %45 = vector.broadcast %c0_i32_18 : i32 to vector<8x8xi32>
    %46 = arith.cmpi sge, %41, %45 : vector<8x8xi32>
    %cst_19 = arith.constant -0.0512932949 : f32
    %47 = vector.broadcast %cst_19 : f32 to vector<8x8xf32>
    %48 = arith.mulf %44, %47 : vector<8x8xf32>
    %49 = math.exp %48 : vector<8x8xf32>
    %cst_20 = arith.constant 5.000000e-02 : f32
    %50 = vector.broadcast %cst_20 : f32 to vector<8x8xf32>
    %51 = arith.mulf %50, %49 : vector<8x8xf32>
    %cst_21 = arith.constant 0.000000e+00 : f32
    %52 = vector.broadcast %cst_21 : f32 to vector<8x8xf32>
    %53 = arith.select %46, %51, %52 : vector<8x8xi1>, vector<8x8xf32>
    %54 = vector.extract_strided_slice %53 {offsets = [0, 0], sizes = [8, 1], strides = [1, 1]} : vector<8x8xf32> to vector<8x1xf32>
    %cst_22 = arith.constant 1.900000e+01 : f32
    %55 = vector.broadcast %cst_22 : f32 to vector<8x1xf32>
    %56 = arith.mulf %55, %54 : vector<8x1xf32>
    %c0_23 = arith.constant 0 : index
    %c0_24 = arith.constant 0 : index
    %57 = vector.load %arg7[%c0_23, %c0_24] : memref<64x128xf32, #tpu.memory_space<vmem>>, vector<64x128xf32>
    %cst_25 = arith.constant dense<0.000000e+00> : vector<8x128xf32>
    %58 = tpu.matmul %38, %57, %cst_25 {dimension_numbers = #tpu.dot_dimension_numbers<[1], [0], [0], [1], [0, 0, 1, 1], [], []>} : vector<8x64xf32>, vector<64x128xf32>, vector<8x128xf32> -> vector<8x128xf32>
    %cst_26 = arith.constant dense<0.000000e+00> : vector<8x128xf32>
    %59 = tpu.matmul %53, %58, %cst_26 {dimension_numbers = #tpu.dot_dimension_numbers<[1], [0], [0], [1], [0, 0, 1, 1], [], []>} : vector<8x8xf32>, vector<8x128xf32>, vector<8x128xf32> -> vector<8x128xf32>
    %c0_27 = arith.constant 0 : index
    %c0_28 = arith.constant 0 : index
    %60 = vector.load %arg15[%c0_27, %c0_28] : memref<1x128xf32, #tpu.memory_space<vmem>>, vector<1x128xf32>
    %61 = vector.broadcast %56 : vector<8x1xf32> to vector<8x128xf32>
    %62 = vector.broadcast %60 : vector<1x128xf32> to vector<8x128xf32>
    %63 = arith.mulf %61, %62 : vector<8x128xf32>
    %64 = arith.addf %59, %63 : vector<8x128xf32>
    %65 = vector.extract_strided_slice %64 {offsets = [7, 0], sizes = [1, 128], strides = [1, 1]} : vector<8x128xf32> to vector<1x128xf32>
    %c0_29 = arith.constant 0 : index
    %c0_30 = arith.constant 0 : index
    %66 = vector.load %arg15[%c0_29, %c0_30] : memref<1x128xf32, #tpu.memory_space<vmem>>, vector<1x128xf32>
    tpu.vector_store %arg15[%c0_29, %c0_30], %65 {strides = array<i32>} : memref<1x128xf32, #tpu.memory_space<vmem>>, vector<1x128xf32>,
    %67 = arith.truncf %64 : vector<8x128xf32> to vector<8x128xbf16>
    %c0_31 = arith.constant 0 : index
    %c0_32 = arith.constant 0 : index
    %68 = vector.load %arg8[%c0_31, %c0_32] : memref<128x64xbf16, #tpu.memory_space<vmem>>, vector<128x64xbf16>
    %cst_33 = arith.constant dense<0.000000e+00> : vector<8x64xf32>
    %69 = tpu.matmul %67, %68, %cst_33 {dimension_numbers = #tpu.dot_dimension_numbers<[1], [0], [0], [1], [0, 0, 1, 1], [], []>} : vector<8x128xbf16>, vector<128x64xbf16>, vector<8x64xf32> -> vector<8x64xf32>
    %c0_34 = arith.constant 0 : index
    %c0_35 = arith.constant 0 : index
    %70 = vector.load %arg9[%c0_34, %c0_35] : memref<1x64xf32, #tpu.memory_space<vmem>>, vector<1x64xf32>
    %71 = vector.broadcast %70 : vector<1x64xf32> to vector<8x64xf32>
    %72 = arith.mulf %71, %38 : vector<8x64xf32>
    %73 = arith.addf %69, %72 : vector<8x64xf32>
    %74 = arith.negf %6 : vector<8x64xf32>
    %75 = math.exp %74 : vector<8x64xf32>
    %cst_36 = arith.constant 1.000000e+00 : f32
    %76 = vector.broadcast %cst_36 : f32 to vector<8x64xf32>
    %77 = arith.addf %76, %75 : vector<8x64xf32>
    %78 = arith.divf %76, %77 : vector<8x64xf32>
    %79 = arith.mulf %6, %78 : vector<8x64xf32>
    %80 = arith.mulf %73, %79 : vector<8x64xf32>
    %81 = arith.truncf %80 : vector<8x64xf32> to vector<8x64xbf16>
    %c0_37 = arith.constant 0 : index
    %c0_38 = arith.constant 0 : index
    %82 = vector.load %arg10[%c0_37, %c0_38] : memref<64x32xbf16, #tpu.memory_space<vmem>>, vector<64x32xbf16>
    %cst_39 = arith.constant dense<0.000000e+00> : vector<8x32xf32>
    %83 = tpu.matmul %81, %82, %cst_39 {dimension_numbers = #tpu.dot_dimension_numbers<[1], [0], [0], [1], [0, 0, 1, 1], [], []>} : vector<8x64xbf16>, vector<64x32xbf16>, vector<8x32xf32> -> vector<8x32xf32>
    %84 = arith.addf %83, %1 : vector<8x32xf32>
    %cst_40 = arith.constant dense<0.000000e+00> : vector<8xf32>
    %85 = vector.multi_reduction <add>, %84, %cst_40 [1] : vector<8x32xf32> to vector<8xf32>
    %86 = vector.shape_cast %85 : vector<8xf32> to vector<8x1xf32>
    %cst_41 = arith.constant 3.200000e+01 : f32
    %87 = vector.broadcast %cst_41 : f32 to vector<8x1xf32>
    %88 = arith.divf %86, %87 : vector<8x1xf32>
    %89 = vector.broadcast %88 : vector<8x1xf32> to vector<8x32xf32>
    %90 = arith.subf %84, %89 : vector<8x32xf32>
    %91 = arith.mulf %90, %90 : vector<8x32xf32>
    %cst_42 = arith.constant dense<0.000000e+00> : vector<8xf32>
    %92 = vector.multi_reduction <add>, %91, %cst_42 [1] : vector<8x32xf32> to vector<8xf32>
    %93 = vector.shape_cast %92 : vector<8xf32> to vector<8x1xf32>
    %cst_43 = arith.constant 3.200000e+01 : f32
    %94 = vector.broadcast %cst_43 : f32 to vector<8x1xf32>
    %95 = arith.divf %93, %94 : vector<8x1xf32>
    %96 = vector.broadcast %88 : vector<8x1xf32> to vector<8x32xf32>
    %97 = arith.subf %84, %96 : vector<8x32xf32>
    %cst_44 = arith.constant 9.99999974E-6 : f32
    %98 = vector.broadcast %cst_44 : f32 to vector<8x1xf32>
    %99 = arith.addf %95, %98 : vector<8x1xf32>
    %100 = math.rsqrt %99 : vector<8x1xf32>
    %101 = vector.broadcast %100 : vector<8x1xf32> to vector<8x32xf32>
    %102 = arith.mulf %97, %101 : vector<8x32xf32>
    %c0_45 = arith.constant 0 : index
    %c0_46 = arith.constant 0 : index
    %103 = vector.load %arg11[%c0_45, %c0_46] : memref<1x32xf32, #tpu.memory_space<vmem>>, vector<1x32xf32>
    %104 = vector.broadcast %103 : vector<1x32xf32> to vector<8x32xf32>
    %105 = arith.mulf %102, %104 : vector<8x32xf32>
    %c0_47 = arith.constant 0 : index
    %c0_48 = arith.constant 0 : index
    %106 = vector.load %arg12[%c0_47, %c0_48] : memref<1x32xf32, #tpu.memory_space<vmem>>, vector<1x32xf32>
    %107 = vector.broadcast %106 : vector<1x32xf32> to vector<8x32xf32>
    %108 = arith.addf %105, %107 : vector<8x32xf32>
    %c0_49 = arith.constant 0 : index
    %c0_50 = arith.constant 0 : index
    %c0_51 = arith.constant 0 : index
    %109 = vector.load %arg13[%c0_49, %c0_50, %c0_51] : memref<1x8x32xf32, #tpu.memory_space<vmem>>, vector<1x8x32xf32>
    %110 = vector.shape_cast %109 : vector<1x8x32xf32> to vector<8x32xf32>
    %111 = vector.shape_cast %108 : vector<8x32xf32> to vector<1x8x32xf32>
    tpu.vector_store %arg13[%c0_49, %c0_50, %c0_51], %111 {strides = array<i32>} : memref<1x8x32xf32, #tpu.memory_space<vmem>>, vector<1x8x32xf32>,
    return
  }
  func.func @transform_0(%arg0: i32, %arg1: i32) -> (i32, i32, i32) {
    %c0_i32 = arith.constant 0 : i32
    %c0_i32_0 = arith.constant 0 : i32
    return %arg0, %arg1, %c0_i32 : i32, i32, i32
  }
  func.func @transform_1(%arg0: i32, %arg1: i32) -> (i32, i32) {
    %c0_i32 = arith.constant 0 : i32
    %c0_i32_0 = arith.constant 0 : i32
    %c0_i32_1 = arith.constant 0 : i32
    return %c0_i32, %c0_i32_0 : i32, i32
  }
  func.func @transform_2(%arg0: i32, %arg1: i32) -> (i32, i32) {
    %c0_i32 = arith.constant 0 : i32
    %c0_i32_0 = arith.constant 0 : i32
    %c0_i32_1 = arith.constant 0 : i32
    return %c0_i32, %c0_i32_0 : i32, i32
  }
  func.func @transform_3(%arg0: i32, %arg1: i32) -> (i32, i32) {
    %c0_i32 = arith.constant 0 : i32
    %c0_i32_0 = arith.constant 0 : i32
    %c0_i32_1 = arith.constant 0 : i32
    return %c0_i32, %c0_i32_0 : i32, i32
  }
  func.func @transform_4(%arg0: i32, %arg1: i32) -> (i32, i32) {
    %c0_i32 = arith.constant 0 : i32
    %c0_i32_0 = arith.constant 0 : i32
    %c0_i32_1 = arith.constant 0 : i32
    return %c0_i32, %c0_i32_0 : i32, i32
  }
  func.func @transform_5(%arg0: i32, %arg1: i32) -> (i32, i32) {
    %c0_i32 = arith.constant 0 : i32
    %c0_i32_0 = arith.constant 0 : i32
    %c0_i32_1 = arith.constant 0 : i32
    return %c0_i32, %c0_i32_0 : i32, i32
  }
  func.func @transform_6(%arg0: i32, %arg1: i32) -> (i32, i32) {
    %c0_i32 = arith.constant 0 : i32
    %c0_i32_0 = arith.constant 0 : i32
    %c0_i32_1 = arith.constant 0 : i32
    return %c0_i32, %c0_i32_0 : i32, i32
  }
  func.func @transform_7(%arg0: i32, %arg1: i32) -> (i32, i32) {
    %c0_i32 = arith.constant 0 : i32
    %c0_i32_0 = arith.constant 0 : i32
    %c0_i32_1 = arith.constant 0 : i32
    return %c0_i32, %c0_i32_0 : i32, i32
  }
  func.func @transform_8(%arg0: i32, %arg1: i32) -> (i32, i32) {
    %c0_i32 = arith.constant 0 : i32
    %c0_i32_0 = arith.constant 0 : i32
    %c0_i32_1 = arith.constant 0 : i32
    return %c0_i32, %c0_i32_0 : i32, i32
  }
  func.func @transform_9(%arg0: i32, %arg1: i32) -> (i32, i32) {
    %c0_i32 = arith.constant 0 : i32
    %c0_i32_0 = arith.constant 0 : i32
    %c0_i32_1 = arith.constant 0 : i32
    return %c0_i32, %c0_i32_0 : i32, i32
  }
  func.func @transform_10(%arg0: i32, %arg1: i32) -> (i32, i32) {
    %c0_i32 = arith.constant 0 : i32
    %c0_i32_0 = arith.constant 0 : i32
    %c0_i32_1 = arith.constant 0 : i32
    return %c0_i32, %c0_i32_0 : i32, i32
  }
  func.func @transform_11(%arg0: i32, %arg1: i32) -> (i32, i32, i32) {
    %c0_i32 = arith.constant 0 : i32
    %c0_i32_0 = arith.constant 0 : i32
    return %arg0, %arg1, %c0_i32 : i32, i32, i32
  }
}

</mosaic_0001>

<bundles_post_ra>
// kernel: tpu_custom_call.1
= control target key start
LH: loop header
LB: loop body
LE: loop exit
PB: predicated region body
PF: predicated region fallthrough
CT: control target
= control target key end

     0   :  { %s1695_s0 = inlined_call_operand.vmem [shape: f32[2,8,32], index: 0, kind: input, shape index: {}]   ;;  %s1696_s1 = inlined_call_operand.vmem [shape: bf16[32,64], index: 1, kind: input, shape index: {}]   ;;  %s1697_s2 = inlined_call_operand.vmem [shape: bf16[32,64], index: 2, kind: input, shape index: {}]   ;;  %s1698_s3 = inlined_call_operand.vmem [shape: f32[4,64], index: 3, kind: input, shape index: {}]   ;;  %s1699_s4 = inlined_call_operand.vmem [shape: f32[1,64], index: 4, kind: input, shape index: {}]   ;;  %s1700_s5 = inlined_call_operand.vmem [shape: f32[64,128], index: 5, kind: input, shape index: {}]   ;;  %s1701_s6 = inlined_call_operand.vmem [shape: bf16[128,64], index: 6, kind: input, shape index: {}]   ;;  %s1702_s7 = inlined_call_operand.vmem [shape: f32[1,64], index: 7, kind: input, shape index: {}]   ;;  %s1703_s8 = inlined_call_operand.vmem [shape: bf16[64,32], index: 8, kind: input, shape index: {}]   ;;  %s1704_s9 = inlined_call_operand.vmem [shape: f32[1,32], index: 9, kind: input, shape index: {}]   ;;  %s1705_s10 = inlined_call_operand.vmem [shape: f32[1,32], index: 10, kind: input, shape index: {}]   ;;  %s1706_s11 = inlined_call_operand.hbm [shape: f32[2,8,32], index: 11, kind: output, shape index: {}]  }
   0x1   :  { %1707 = sst [smem:[#allocation7_spill]] %s1695_s0 }
   0x2   :  { %1708 = sst [smem:[#allocation8_spill]] %s1696_s1 }
   0x3   :  { %1709 = sst [smem:[#allocation9_spill]] %s1697_s2 }
   0x4   :  { %1710 = sst [smem:[#allocation10_spill]] %s1698_s3 }
   0x5   :  { %16 = vsyncpa [#allocation5], 0 }
   0x6   :  { %18 = vsyncpa [#allocation5 + $0x1], 0  ;;  %s1448_s17 = smov 0   ;;  %s1450_s18 = smov 0  }
   0x7   :  { %s1452_s19 = smov 0   ;;  %s1454_s20 = smov 0  }
   0x8   :  { %s1456_s21 = smov 0   ;;  %s1458_s22 = smov 0  }
   0x9 LB: > { %s1075_s23 = sadd.s32 4294967295, %s1382_s22   ;;  %s1076_s24 = sadd.s32 4294967294, %s1382_s22   ;;  %s1382_s22 = sphi %s1458_s22, %s24_s22   ;;  %s1378_s21 = sphi %s1456_s21, %s1721_s21   ;;  %s1374_s20 = sphi %s1454_s20, %s1720_s20   ;;  %s1370_s19 = sphi %s1452_s19, %s1719_s19   ;;  %s1366_s18 = sphi %s1450_s18, %s1718_s18   ;;  %s1362_s17 = sphi %s1448_s17, %s1717_s17  }
   0xa   : > { %s36_s25 = sadd.s32 1, %s1378_s21  ;;  %s283_s26 = sadd.s32 1, %s1370_s19 }
   0xb   : > { %p38_p0 = scmp.ge.s32.totalorder %s36_s25, 2  ;;  %p293_p1 = scmp.ne.s32.totalorder %s1370_s19, %s1366_s18 }
   0xc   : > { %p294_p2 = scmp.eq.s32.totalorder %s1075_s23, 1  ;;  %p299_p3 = scmp.ne.s32.totalorder %s1366_s18, %s1362_s17 }
   0xd   : > { %s1723_s25 = smov (%p38_p0, %s36_s25), 0  ;;  %p300_p5 = scmp.eq.s32.totalorder %s1076_s24, 1 }
   0xe   : > { %p1488_p4 = por %p294_p2, %p293_p1  ;;  %s278_s28 = ssub.s32 %s1378_s21, %s1723_s25 }
   0xf   : > { %p1079_p6 = scmp.ge.s32.totalorder %s1382_s22, 1  ;;  %p281_p7 = scmp.eq.s32.totalorder %s278_s28, 0 }
  0x10   : > { %p1495_p8 = por %p300_p5, %p299_p3  ;;  %p358_p9 = scmp.lt.s32.totalorder %s1382_s22, 3 }
  0x11   : > { %s1501_s30 = scalar_select %p281_p7, %s1370_s19, %s283_s26  }
  0x12   : > { %p359_p10 = pnand %p1079_p6, %p358_p9 }
  0x13   : > { %s1713_s1 = sld [smem:[#allocation8_spill]] (!%p359_p10)  ;;  %p400_p11 = scmp.lt.s32.totalorder (!%p359_p10), %s1374_s20, 1 }
  0x14   : > { %362 = sbr.rel (%p359_p10) target bundleno = 1383 (0x567), region = 64  ;;  %s1714_s0 = sld [smem:[#allocation7_spill]] (!%p359_p10) }
  0x15   : > { %s1715_s3 = sld [smem:[#allocation10_spill]] (!%p359_p10)  ;;  %s1113_s14 = sshll.u32 (!%p359_p10), %s1374_s20, 7 }
  0x16   : > { %s1716_s2 = sld [smem:[#allocation9_spill]] (!%p359_p10) }
  0x19   : > { %v1278_v0 = vld [vmem:[%s1713_s1 + $0x8] sm:$0xff]   ;;  %v1384_v1 = vmov 0.0   ;;  %v1279_v2 = vld [vmem:[%s1713_s1] sm:$0xff]   ;;  %vm1385_vm0 = vmmov 0   ;;  %s401_s16 = scalar_select %p400_p11, %s1374_s20, 1  ;;  %vm426_vm1 = vcmask 261120   ;;  %v536_v13 = vlaneseq }
  0x1a   : > { %1147 = vmatprep.subr.bf16.mxu0 %v1384_v1  ;;  %532 = vst [vmem:[#allocation3] sm:$0x1] %v1384_v1  ;;  %1155 = vmatprep.subr.bf16.mxu1 %v1384_v1  ;;  %vm530_vm2 = vcmask 523264   ;;  %v599_v5 = vld [vmem:[%s1700_s5 + $0x38] sm:$0xff]  ;;  %v598_v6 = vld [vmem:[%s1700_s5 + $0x30] sm:$0xff]  ;;  %v597_v7 = vld [vmem:[%s1700_s5 + $0x28] sm:$0xff] }
  0x1b   : > { %1148 = vmatpush3.bf16.msra.mxu0 %v1278_v0  ;;  %1151 = vmatprep.mubr.msk.bf16.mxu0 %vm1385_vm0, %v1384_v1  ;;  %s1081_s23 = sshll.u32 %s401_s16, 3  ;;  %531 = vst.msk [vmem:[#allocation2] sm:$0xff] %vm530_vm2, %v1384_v1  ;;  %v596_v8 = vld [vmem:[%s1700_s5 + $0x20] sm:$0xff]  ;;  %v595_v9 = vld [vmem:[%s1700_s5 + $0x18] sm:$0xff]  ;;  %v594_v10 = vld [vmem:[%s1700_s5 + $0x10] sm:$0xff]  ;;  %v537_v14 = vshrl.u32 %v536_v13, 7 }
  0x1c   : > { %1149 = vmatprep.subr.bf16.mxu0 %v1384_v1  ;;  %1159 = vmatprep.mubr.msk.bf16.mxu1 %vm1385_vm0, %v1384_v1  ;;  %s406_s28 = scalar_lea.vmem %s1714_s0, %s1081_s23  ;;  %v593_v11 = vld [vmem:[%s1700_s5 + $0x8] sm:$0xff]  ;;  %v592_v12 = vld [vmem:[%s1700_s5] sm:$0xff]  ;;  %v580_v45 = vand.u32 127, %v536_v13  ;;  %v1386_v56 = vmov 0   ;;  %v1282_v58 = vld [vmem:[%s1701_s6 + $0x38] sm:$0xff]   ;;  %vm686_vm5 = vcmask 64512  }
  0x1d   : > { %v1523_v3 = vld [vmem:[%s406_s28] sm:$0xff]  ;;  %v538_v15 = vsub.s32 3, %v537_v14  ;;  %v552_v19 = vsub.s32 2, %v537_v14  ;;  %v559_v21 = vsub.s32 1, %v537_v14  ;;  %v566_v25 = vsub.s32 0, %v537_v14  ;;  %v1280_v55 = vld [vmem:[%s1716_s2 + $0x8] sm:$0xff]   ;;  %1277 = vset.pattern.permute.xlu0 %v1386_v56 }
  0x1e   : > { %v1527_v4 = vpack.c.bf16 %v1523_v3, %v1523_v3  ;;  %v535_v16 = vld [vmem:[%s1715_s3] sm:$0xf]  ;;  %v581_v46 = vsub.s32 %v537_v14, %v580_v45  ;;  %1156 = vmatpush3.bf16.msra.mxu1 %v1280_v55  ;;  %v1283_v59 = vld [vmem:[%s1701_s6 + $0x30] sm:$0xff]   ;;  %v1284_v60 = vld [vmem:[%s1701_s6 + $0x28] sm:$0xff]   ;;  %s397_s23 = sand.u32 1, %s1366_s18   ;;  %s1387_s28 = smov [#allocation4]  }
  0x1f   : > { %1150 = vmatpush3.bf16.msra.mxu0 %v1279_v2  ;;  %v539_v18 = vrot.slane %v535_v16, %v538_v15  ;;  %v553_v24 = vrot.slane %v535_v16, %v552_v19  ;;  %v1088_v26 = vld [vmem:[%s1699_s4] ss:$0 sm:$0xff]  ;;  %v560_v28 = vrot.slane %v535_v16, %v559_v21  ;;  %v567_v33 = vrot.slane %v535_v16, %v566_v25  ;;  %v1286_v62 = vld [vmem:[%s1701_s6 + $0x18] sm:$0xff]   ;;  %v1287_v63 = vld [vmem:[%s1701_s6 + $0x10] sm:$0xff]   ;;  %s1080_s24 = sshll.u32 %s397_s23, 3  ;;  %s990_s3 = scalar_lea.sflag [#allocation5], %s397_s23 }
  0x20   : > { %1163 = vmatprep.subr.mxu0 %v1384_v1  ;;  %v1090_v47 = vcvt.s32.f32 %v581_v46  ;;  %vm582_vm3 = vcmp.gt.s32.totalorder %v581_v46, 0  ;;  %vm585_vm4 = vcmp.ge.s32.totalorder %v581_v46, 0  ;;  %v1281_v57 = vld [vmem:[%s1716_s2] sm:$0xff]   ;;  %1157 = vmatprep.subr.bf16.mxu1 %v1384_v1  ;;  %v1288_v0 = vld [vmem:[%s1701_s6 + $0x8] sm:$0xff]   ;;  %s399_s15 = scalar_lea.vmem [#allocation4], %s1080_s24  ;;  %s1002_s2 = scalar_lea.hbm %s1706_s11, %s1113_s14 }
  0x21   : > { %v1285_v61 = vld [vmem:[%s1701_s6 + $0x20] sm:$0xff]   ;;  %v1093_v13 = vld [vmem:[#allocation3] ss:$0 sm:$0xff]  ;;  %v1292_v19 = vld [vmem:[%s1703_s8 + $0x8] sm:$0xff]   ;;  %s1004_s16 = sshll.u32 %s399_s15, 4  ;;  %s1310_s12 = sshll.u32 %s1387_s28, 4  ;;  %s1005_s16 = int_to_ptr.vmem [resolvable:$true] %s1004_s16  ;;  %s1311_s12 = int_to_ptr.vmem [resolvable:$false] %s1310_s12 }
  0x22   : > { %1152 = vmatmul.mubr.msk.bf16.vlgmr.msra.gmra.mxu0 %vm426_vm1, %v1527_v4  ;;  %v1091_v48 = vsel %vm582_vm3, %v1090_v47, 0.0  ;;  %1158 = vmatpush3.bf16.msra.mxu1 %v1281_v57  ;;  %s1306_s26 = scalar_lea.vmem %s1005_s16, 128  ;;  %s1312_s20 = scalar_lea.vmem %s1311_s12, 256 }
  0x23   : > { %1179 = vmatprep.mubr.msk.f32.mxu0 %vm1385_vm0, %v1384_v1  ;;  %1164 = vmatpush3.msra.mxu0 %v599_v5  ;;  %v586_v49 = vmul.f32 -0.051293295, %v1091_v48  ;;  %v1289_v5 = vld [vmem:[%s1701_s6] sm:$0xff]   ;;  %p1307_p12 = scmp.ne.s32.totalorder %s1005_s16, %s1306_s26  ;;  %p1313_p1 = scmp.lt.s32.totalorder %s1005_s16, %s1311_s12 }
  0x24   : > { %1165 = vmatprep.subr.mxu0 %v1384_v1  ;;  %1187 = vmatprep.subr.bf16.mxu1 %v1384_v1  ;;  %v1110_v48 = vld [vmem:[%s1704_s9] ss:$0 sm:$0xff]  ;;  %p1314_p2 = scmp.lt.s32.totalorder %s1312_s20, %s1306_s26 }
  0x25   : > { %1166 = vmatpush3.msra.mxu0 %v598_v6  ;;  %v587_v50 = vmul.f32 1.442695, %v586_v49  ;;  %1160 = vmatmul.mubr.msk.bf16.vlgmr.msra.gmra.mxu1 %vm426_vm1, %v1527_v4  ;;  %v1290_v6 = vld [vmem:[%s1703_s8 + $0x18] sm:$0xff]   ;;  %p1308_p13 = pnand %p1307_p12, %p1488_p4 }
  0x26   : > { %1167 = vmatprep.subr.mxu0 %v1384_v1  ;;  %1188 = vmatpush3.bf16.msra.mxu1 %v1282_v58  ;;  %p1315_p3 = por %p1314_p2, %p1313_p1 }
  0x27   : > { %1168 = vmatpush3.msra.mxu0 %v597_v7  ;;  %1203 = vmatprep.mubr.msk.bf16.mxu1 %vm1385_vm0, %v1384_v1  ;;  %v1291_v7 = vld [vmem:[%s1703_s8 + $0x10] sm:$0xff]   ;;  %p1309_p0 = pneg %p1308_p13 }
  0x28   : > { %1169 = vmatprep.subr.mxu0 %v1384_v1  ;;  %1189 = vmatprep.subr.bf16.mxu1 %v1384_v1 }
  0x29   : > { %1170 = vmatpush3.msra.mxu0 %v596_v8  ;;  %p1316_p5 = pnand %p1315_p3, %p1309_p0 }
  0x2a   : > { %1171 = vmatprep.subr.mxu0 %v1384_v1  ;;  %1190 = vmatpush3.bf16.msra.mxu1 %v1283_v59 }
  0x2b   : > { %1172 = vmatpush3.msra.mxu0 %v595_v9  ;;  %1191 = vmatprep.subr.bf16.mxu1 %v1384_v1 }
  0x2c   : > { %1173 = vmatprep.subr.mxu0 %v1384_v1 }
  0x2d   : > { %1174 = vmatpush3.msra.mxu0 %v594_v10 }
  0x2e   : > { %1175 = vmatprep.subr.mxu0 %v1384_v1  ;;  %1192 = vmatpush3.bf16.msra.mxu1 %v1284_v60 }
  0x2f   : > { %1176 = vmatpush3.msra.mxu0 %v593_v11  ;;  %1193 = vmatprep.subr.bf16.mxu1 %v1384_v1 }
  0x30   : > { %1177 = vmatprep.subr.mxu0 %v1384_v1 }
  0x31   : > { %1178 = vmatpush3.msra.mxu0 %v592_v12 }
  0x32   : > { %1182 = vmatprep.subr.mxu0 %v1384_v1  ;;  %1194 = vmatpush3.bf16.msra.mxu1 %v1285_v61 }
  0x33   : > { %1195 = vmatprep.subr.bf16.mxu1 %v1384_v1 }
  0x36   : > { %1196 = vmatpush3.bf16.msra.mxu1 %v1286_v62 }
  0x37   : > { %1197 = vmatprep.subr.bf16.mxu1 %v1384_v1 }
  0x3a   : > { %1198 = vmatpush3.bf16.msra.mxu1 %v1287_v63 }
  0x3b   : > { %1199 = vmatprep.subr.bf16.mxu1 %v1384_v1 }
  0x3e   : > { %1200 = vmatpush3.bf16.msra.mxu1 %v1288_v0 }
  0x3f   : > { %1201 = vmatprep.subr.bf16.mxu1 %v1384_v1 }
  0x42   : > { %1202 = vmatpush3.bf16.msra.mxu1 %v1289_v5 }
  0xe2   : > { %v464_v17 = vpop.f32.mrf.mxu0 }
  0xe3   : > { %534 = vst.msk [vmem:[#allocation2 + $0x8] sm:$0xff] %vm530_vm2, %v464_v17  ;;  %v540_v23 = vmul.f32 %v539_v18, %v464_v17 }
  0xe4   : > { %v1153_v20 = vpop.f32.mrf.mxu0 }
  0xe5   : > { %v548_v31 = vadd.f32 %v1088_v26, %v540_v23  ;;  %v520_v8 = vpop.f32.mrf.mxu1  ;;  %v1293_v20 = vld [vmem:[%s1703_s8] sm:$0xff]  }
  0xe6   : > { %v467_v22 = vpop.f32.mrf.mxu0  ;;  %v1104_v21 = vmul.f32 -1.442695, %v520_v8 }
  0xe7   : > { %v1161_v9 = vpop.f32.mrf.mxu1 }
  0xe8   : > { %v1154_v27 = vpop.f32.mrf.mxu0 }
  0xe9   : > { %v523_v10 = vpop.f32.mrf.mxu1 }
  0xea   : > { %v549_v29 = vld [vmem:[#allocation2 + $0x7] sm:$0xff] }
  0xeb   : > { %v556_v30 = vld [vmem:[#allocation2 + $0x6] sm:$0xff]  ;;  %v554_v32 = vmul.f32 %v553_v24, %v549_v29  ;;  %v1162_v11 = vpop.f32.mrf.mxu1  ;;  %v1095_v24 = vld [vmem:[%s1702_s7] ss:$0 sm:$0xff] }
  0xec   : > { %v563_v34 = vld [vmem:[#allocation2 + $0x5] sm:$0xff]  ;;  %v561_v36 = vmul.f32 %v560_v28, %v556_v30 }
  0xed   : > { %v555_v35 = vadd.f32 %v554_v32, %v548_v31  ;;  %v568_v38 = vmul.f32 %v567_v33, %v563_v34 }
  0xef   : > { %v562_v37 = vadd.f32 %v561_v36, %v555_v35 }
  0xf1   : > { %v569_v39 = vadd.f32 %v568_v38, %v562_v37 }
  0xf3   : > { %v1089_v40 = vmul.f32 -1.442695, %v569_v39 }
  0xf5   : > { %1294 = vpow2.f32 %v1089_v40 }
 0x102   : > { %v1295_v41 = vpop.eup %1294 }
 0x103   : > { %v573_v42 = vadd.f32 1.0, %v1295_v41 }
 0x105   : > { %1296 = vrcp.f32 %v573_v42 }
 0x106   : > { %1298 = vpow2.f32 %v587_v50  ;;  %v1111_v50 = vld [vmem:[%s1705_s10] ss:$0 sm:$0xff] }
 0x107   : > { %1300 = vpow2.f32 %v1104_v21 }
 0x112   : > { %v1297_v43 = vpop.eup %1296 }
 0x113   : > { %v1574_v44 = vmul.f32 %v1297_v43, %v569_v39  ;;  %v1299_v51 = vpop.eup %1298 }
 0x114   : > { %v589_v52 = vmul.f32 0.05, %v1299_v51  ;;  %v1301_v22 = vpop.eup %1300 }
 0x115   : > { %1180 = vmatmul.mubr.msk.f32.vlgmr.msra.gmra.mxu0 %vm530_vm2, %v1574_v44  ;;  %v877_v23 = vadd.f32 1.0, %v1301_v22  ;;  %v785_v26 = vmul.f32 %v1095_v24, %v1574_v44 }
 0x116   : > { %1184 = vmatprep.mubr.msk.f32.mxu0 %vm1385_vm0, %v1384_v1  ;;  %v590_v53 = vsel %vm585_vm4, %v589_v52, 0.0 }
 0x117   : > { %v591_v54 = vmul.f32 19.0, %v590_v53  ;;  %1302 = vrcp.f32 %v877_v23 }
 0x119   : > { %676 = vperm.xlu0 %1277, %v591_v54  }
 0x124   : > { %v1303_v25 = vpop.eup %1302 }
 0x125   : > { %v880_v28 = vmul.f32 %v1303_v25, %v520_v8 }
 0x194   : > { %v677_v12 = vpop.permute.xlu0 %676 }
 0x195   : > { %v685_v14 = vmul.f32 %v1093_v13, %v677_v12 }
 0x1d5   : > { %v669_v2 = vpop.f32.mrf.mxu0 }
 0x1d6   : > { %1183 = vmatpush3.msra.mxu0 %v669_v2 }
 0x1d7   : > { %v1181_v4 = vpop.f32.mrf.mxu0  ;;  %1185 = vmatmul.mubr.msk.f32.vlgmr.msra.gmra.mxu0 %vm686_vm5, %v590_v53  ;;  %1207 = vmatprep.subr.bf16.mxu0 %v1384_v1 }
 0x1d8   : > { %1215 = vmatprep.mubr.msk.bf16.mxu0 %vm1385_vm0, %v1384_v1  ;;  %1208 = vmatpush3.bf16.msra.mxu0 %v1290_v6 }
 0x1d9   : > { %1209 = vmatprep.subr.bf16.mxu0 %v1384_v1 }
 0x1dc   : > { %1210 = vmatpush3.bf16.msra.mxu0 %v1291_v7 }
 0x1dd   : > { %1211 = vmatprep.subr.bf16.mxu0 %v1384_v1 }
 0x1e0   : > { %1212 = vmatpush3.bf16.msra.mxu0 %v1292_v19 }
 0x1e1   : > { %1213 = vmatprep.subr.bf16.mxu0 %v1384_v1 }
 0x1e4   : > { %1214 = vmatpush3.bf16.msra.mxu0 %v1293_v20 }
 0x297   : > { %v756_v15 = vpop.f32.mrf.mxu0 }
 0x298   : > { %v757_v16 = vadd.f32 %v756_v15, %v685_v14 }
 0x299   : > { %v1186_v17 = vpop.f32.mrf.mxu0 }
 0x29a   : > { %760 = vst [vmem:[#allocation3 - $0x7] sm:$0x80] %v757_v16  ;;  %v761_v18 = vpack.c.bf16 %v757_v16, %v757_v16 }
 0x29c   : > { %1204 = vmatmul.mubr.bf16.vlgmr.msra.gmra.mxu1 %v761_v18 }
 0x35c   : > { %v868_v27 = vpop.f32.mrf.mxu1 }
 0x35d   : > { %v869_v1 = vadd.f32 %v868_v27, %v785_v26 }
 0x35e   : > { %v1205_v29 = vpop.f32.mrf.mxu1 }
 0x35f   : > { %v881_v30 = vmul.f32 %v880_v28, %v869_v1 }
 0x360   : > { %v871_v31 = vpop.f32.mrf.mxu1 }
 0x361   : > { %v882_v32 = vpack.c.bf16 %v881_v30, %v881_v30 }
 0x362   : > { %v1206_v33 = vpop.f32.mrf.mxu1 }
 0x363   : > { %1216 = vmatmul.mubr.msk.bf16.vlgmr.msra.gmra.mxu0 %vm530_vm2, %v882_v32 }
 0x423   : > { %v952_v34 = vpop.f32.mrf.mxu0 }
 0x424   : > { %v953_v35 = vadd.f32 %v952_v34, %v1523_v3 }
 0x425   : > { %v1217_v36 = vpop.f32.mrf.mxu0 }
 0x426   : > { %v958_v37 = vsel %vm426_vm1, %v953_v35, 0.0 }
 0x427   : > { %959 = vadd.xlane.f32.xlu0 %v958_v37  ;;  %v955_v38 = vpop.f32.mrf.mxu0 }
 0x429   : > { %v1218_v39 = vpop.f32.mrf.mxu0 }
 0x4b0   : > { %v960_v40 = vpop.xlane.xlu0 %959 }
 0x4b1   : > { %v962_v41 = vmul.f32 0.03125, %v960_v40 }
 0x4b3   : > { %v963_v42 = vsub.f32 %v953_v35, %v962_v41 }
 0x4b5   : > { %v964_v43 = vmul.f32 %v963_v42, %v963_v42 }
 0x4b7   : > { %v965_v44 = vsel %vm426_vm1, %v964_v43, 0.0 }
 0x4b8   : > { %966 = vadd.xlane.f32.xlu1 %v965_v44 }
 0x541   : > { %v967_v45 = vpop.xlane.xlu1 %966 }
 0x542   : > { %v968_v46 = vmul.f32 0.03125, %v967_v45 }
 0x544   : > { %v969_v47 = vadd.f32 1e-05, %v968_v46 }
 0x546   : > { %1304 = vrsqrt.f32 %v969_v47 }
 0x553   : > { %v1305_v3 = vpop.eup %1304 }
 0x554   : > { %v971_v49 = vmul.f32 %v1305_v3, %v963_v42 }
 0x556   : > { %v979_v51 = vmul.f32 %v1110_v48, %v971_v49 }
 0x558   : > { %v987_v52 = vadd.f32 %v1111_v50, %v979_v51 }
 0x55a   : > { %988 = vst.msk [vmem:[%s399_s15] sm:$0xff] %vm426_vm1, %v987_v52 }
 0x55b   : > { %1319 = shalt.err (!%p1316_p5)
}
 0x55c   : > { %s1320_s0 = scalar_lea.hbm %s1002_s2, 128  ;;  %s1324_s24 = scalar_lea.hbm %s1706_s11, 256 }
 0x55d   : > { %p1321_p6 = scmp.ne.s32.totalorder %s1002_s2, %s1320_s0  ;;  %p1325_p10 = scmp.lt.s32.totalorder %s1002_s2, %s1706_s11 }
 0x55e   : > { %p1326_p11 = scmp.lt.s32.totalorder %s1324_s24, %s1320_s0 }
 0x55f   : > { %p1322_p7 = pnand %p1321_p6, %p1488_p4 }
 0x560   : > { %p1327_p12 = por %p1326_p11, %p1325_p10 }
 0x561   : > { %p1323_p9 = pneg %p1322_p7 }
 0x563   : > { %p1328_p13 = pnand %p1327_p12, %p1323_p9 }
 0x565   : > { %1331 = shalt.err (!%p1328_p13)
}
 0x566   : > { %1219 = dma.vmem_to_hbm [thread:$0]  (%p1488_p4), %s1005_s16, 128, %s1002_s2, %s990_s3  }
 0x567 PF: > { %p1225_p0 = scmp.ge.s32.totalorder %s1382_s22, 2  ;;  %s1016_s15 = sand.u32 1, %s1362_s17  }
 0x568   : > { %s1017_s26 = scalar_lea.sflag [#allocation5], %s1016_s15 }
 0x569   : > { %p1222_p1 = pnand %p1225_p0, %p1495_p8 }
 0x56b   : > { %p1223_p2 = pneg %p1222_p1 }
 0x56d   : > { %1357 = dma.done.wait (%p1223_p2), %s1017_s26, 128  }
 0x56e   : > { %1359 = vsyncadd (%p1223_p2), %s1017_s26, 4294967168  ;;  %s24_s22 = sadd.s32 1, %s1382_s22   ;;  %s1717_s17 = smov %s1366_s18 }
 0x56f   : > { %p21_p3 = scmp.ge.s32.totalorder %s24_s22, 4   ;;  %s1718_s18 = smov %s1370_s19 }
 0x570   : > { %s1719_s19 = smov %s1501_s30  ;;  %s1720_s20 = smov %s1378_s21 }
 0x571   : > { %s1721_s21 = smov %s1723_s25  ;;  %23 = sbr.rel (!%p21_p3) target bundleno = 9 (0x9), region = 103 }
 0x576   :  { %1022 = vsyncpa [#allocation5], 1 }
 0x577   :  { %1024 = vsyncpa [#allocation5 + $0x1], 1 }

</bundles_post_ra>
